<compile_context>
chip_gen: v7x
topology: tpu7x:2x2x1
jax: 0.10.0
libtpu: 0.0.40
codegen_flags: <defaults>
</compile_context>

<pallas_src>
import jax
import jax.numpy as jnp
from jax import lax
from jax.experimental import pallas as pl
from jax.experimental.pallas import tpu as pltpu


def _round_up(x, m):
    return (x + m - 1) // m * m


def _pick_time_chunk(S, target=32):
    """Largest divisor of S that is <= target (keeps the time grid exact, no padding)."""
    best = 1
    for d in range(1, min(S, target) + 1):
        if S % d == 0:
            best = d
    return best


# Keep per-kernel VMEM comfortably inside the smallest scoped default (32 MiB on v6e/v7x).
_VMEM_LIMIT = 32 * 1024 * 1024


# ----------------------------------------------------------------------------
# Kernel 1: input projection  gates_x = x @ W_ih^T + (b_ih + b_hh)
#           one big matmul per time chunk, no recurrence -> 'parallel' grid.
# ----------------------------------------------------------------------------
def _input_proj_kernel(x_ref, w_ref, b_ref, o_ref):
    # x_ref: (T, Bp, Dp) f32   w_ref: (Dp, 4Hp) bf16   b_ref: (1, 4Hp) f32
    # o_ref: (T, Bp, 4Hp) f32
    T, Bp, Dp = x_ref.shape
    G = w_ref.shape[1]
    x2d = x_ref[...].reshape(T * Bp, Dp).astype(jnp.bfloat16)
    gates = jnp.dot(x2d, w_ref[...], preferred_element_type=jnp.float32) + b_ref[...]
    o_ref[...] = gates.reshape(T, Bp, G)


def input_projection(x_tm, wih_t, bias, t_chunk):
    S, Bp, Dp = x_tm.shape
    G = wih_t.shape[1]
    return pl.pallas_call(
        _input_proj_kernel,
        out_shape=jax.ShapeDtypeStruct((S, Bp, G), jnp.float32),
        grid_spec=pltpu.PrefetchScalarGridSpec(
            num_scalar_prefetch=0,
            grid=(S // t_chunk,),
            in_specs=[
                pl.BlockSpec((t_chunk, Bp, Dp), lambda i: (i, 0, 0)),
                pl.BlockSpec((Dp, G), lambda i: (0, 0)),
                pl.BlockSpec((1, G), lambda i: (0, 0)),
            ],
            out_specs=pl.BlockSpec((t_chunk, Bp, G), lambda i: (i, 0, 0)),
        ),
        compiler_params=pltpu.CompilerParams(
            dimension_semantics=("parallel",),
            vmem_limit_bytes=_VMEM_LIMIT,
        ),
    )(x_tm, wih_t, bias)


# ----------------------------------------------------------------------------
# Kernel 2: recurrence. Per step only h @ W_hh^T + gates_x[t]; h/c in scratch.
# Gate packing inside the 4Hp axis is (i, f, o, g): one sigmoid over [0:3Hp].
# ----------------------------------------------------------------------------
def _lstm_recurrent_kernel(gx_ref, whh_ref, y_ref, hN_ref, cN_ref, h_scr, c_scr):
    T = gx_ref.shape[0]
    Hp = whh_ref.shape[0]

    @pl.when(pl.program_id(0) == 0)
    def _():
        h_scr[...] = jnp.zeros_like(h_scr)
        c_scr[...] = jnp.zeros_like(c_scr)

    whh = whh_ref[...]                      # (Hp, 4Hp) bf16, resident across steps

    def step(t, carry):
        gates = gx_ref[t] + jnp.dot(
            h_scr[...].astype(jnp.bfloat16), whh, preferred_element_type=jnp.float32)
        sig = jax.nn.sigmoid(gates[:, 0:3 * Hp])        # i | f | o  in one EUP pass
        i_g = sig[:, 0:Hp]
        f_g = sig[:, Hp:2 * Hp]
        o_g = sig[:, 2 * Hp:3 * Hp]
        g_g = jnp.tanh(gates[:, 3 * Hp:4 * Hp])
        c_new = f_g * c_scr[...] + i_g * g_g
        h_new = o_g * jnp.tanh(c_new)
        c_scr[...] = c_new
        h_scr[...] = h_new
        y_ref[t] = h_new
        return carry

    lax.fori_loop(0, T, step, 0, unroll=min(8, T))

    @pl.when(pl.program_id(0) == pl.num_programs(0) - 1)
    def _():
        hN_ref[...] = h_scr[...]
        cN_ref[...] = c_scr[...]


def lstm_recurrence(gx, whh_t, t_chunk):
    S, Bp, G = gx.shape
    Hp = whh_t.shape[0]
    return pl.pallas_call(
        _lstm_recurrent_kernel,
        out_shape=(
            jax.ShapeDtypeStruct((S, Bp, Hp), jnp.float32),
            jax.ShapeDtypeStruct((Bp, Hp), jnp.float32),
            jax.ShapeDtypeStruct((Bp, Hp), jnp.float32),
        ),
        grid_spec=pltpu.PrefetchScalarGridSpec(
            num_scalar_prefetch=0,
            grid=(S // t_chunk,),
            in_specs=[
                pl.BlockSpec((t_chunk, Bp, G), lambda i: (i, 0, 0)),
                pl.BlockSpec((Hp, G), lambda i: (0, 0)),
            ],
            out_specs=(
                pl.BlockSpec((t_chunk, Bp, Hp), lambda i: (i, 0, 0)),
                pl.BlockSpec((Bp, Hp), lambda i: (0, 0)),
                pl.BlockSpec((Bp, Hp), lambda i: (0, 0)),
            ),
            scratch_shapes=[
                pltpu.VMEM((Bp, Hp), jnp.float32),   # h state
                pltpu.VMEM((Bp, Hp), jnp.float32),   # c state
            ],
        ),
        compiler_params=pltpu.CompilerParams(
            dimension_semantics=("arbitrary",),      # sequential recurrence over time
            vmem_limit_bytes=_VMEM_LIMIT,
        ),
    )(gx, whh_t)


# ----------------------------------------------------------------------------
# Kernel 3: fused Linear + Sigmoid, gridded over time chunks, lane-padded output.
# ----------------------------------------------------------------------------
def _linear_sigmoid_kernel(x_ref, w_ref, b_ref, o_ref):
    T, Bp, Hp = x_ref.shape
    Op = w_ref.shape[1]
    x2d = x_ref[...].reshape(T * Bp, Hp).astype(jnp.bfloat16)
    logits = jnp.dot(x2d, w_ref[...], preferred_element_type=jnp.float32) + b_ref[...]
    o_ref[...] = jax.nn.sigmoid(logits).reshape(T, Bp, Op)


def linear_sigmoid(y_tm, w_t, bias, t_chunk):
    S, Bp, Hp = y_tm.shape
    Op = w_t.shape[1]
    return pl.pallas_call(
        _linear_sigmoid_kernel,
        out_shape=jax.ShapeDtypeStruct((S, Bp, Op), jnp.float32),
        grid_spec=pltpu.PrefetchScalarGridSpec(
            num_scalar_prefetch=0,
            grid=(S // t_chunk,),
            in_specs=[
                pl.BlockSpec((t_chunk, Bp, Hp), lambda i: (i, 0, 0)),
                pl.BlockSpec((Hp, Op), lambda i: (0, 0)),
                pl.BlockSpec((1, Op), lambda i: (0, 0)),
            ],
            out_specs=pl.BlockSpec((t_chunk, Bp, Op), lambda i: (i, 0, 0)),
        ),
        compiler_params=pltpu.CompilerParams(
            dimension_semantics=("parallel",),
            vmem_limit_bytes=_VMEM_LIMIT,
        ),
    )(y_tm, w_t, bias)


# ----------------------------------------------------------------------------
# One-time parameter preparation: transpose, pad to (8,128) tiles, fold biases,
# reorder gate packing from PyTorch (i,f,g,o) to kernel layout (i,f,o,g).
# ----------------------------------------------------------------------------
def prepare_params(params, input_size, hidden_size, output_size):
    H = hidden_size
    Hp = _round_up(H, 128)
    Din_p = _round_up(input_size, 128)
    Op = _round_up(output_size, 128)
    src_order = (0, 1, 3, 2)          # dest blocks (i,f,o,g) <- PyTorch blocks (i,f,o,g idx)

    prepared = {
        "lstm": [],
        "hidden_size": H, "output_size": output_size, "input_size": input_size,
        "Hp": Hp, "din_p": Din_p, "Op": Op,
    }
    for layer_idx, layer in enumerate(params["lstm"]):
        d_in = input_size if layer_idx == 0 else H
        d_in_p = Din_p if layer_idx == 0 else Hp
        w_ih = layer["w_ih"]                       # (4H, d_in)
        w_hh = layer["w_hh"]                       # (4H, H)
        b = layer["b_ih"] + layer["b_hh"]          # (4H,)

        wih_t = jnp.zeros((d_in_p, 4 * Hp), jnp.float32)
        whh_t = jnp.zeros((Hp, 4 * Hp), jnp.float32)
        bias = jnp.zeros((1, 4 * Hp), jnp.float32)
        for dst, src in enumerate(src_order):
            wih_t = wih_t.at[:d_in, dst * Hp:dst * Hp + H].set(
                w_ih[src * H:(src + 1) * H, :].T)
            whh_t = whh_t.at[:H, dst * Hp:dst * Hp + H].set(
                w_hh[src * H:(src + 1) * H, :].T)
            bias = bias.at[0, dst * Hp:dst * Hp + H].set(b[src * H:(src + 1) * H])

        prepared["lstm"].append({
            "wih_t": wih_t.astype(jnp.bfloat16),
            "whh_t": whh_t.astype(jnp.bfloat16),
            "b": bias,                             # f32, folded into gates_x
        })

    lw = jnp.zeros((Hp, Op), jnp.float32).at[:H, :output_size].set(params["linear"]["w"].T)
    lb = jnp.zeros((1, Op), jnp.float32).at[0, :output_size].set(params["linear"]["b"])
    prepared["linear"] = {"w": lw.astype(jnp.bfloat16), "b": lb}
    return prepared


# ----------------------------------------------------------------------------
# Full forward pass (mirrors TimeSeriesClassifierRNN.forward).
# ----------------------------------------------------------------------------
def time_series_classifier_rnn(x, prepared):
    """x: (B, S, input_size) batch_first.  Returns (probas, (h_n, c_n))."""
    B, S, Din = x.shape
    H = prepared["hidden_size"]
    O = prepared["output_size"]
    Hp, Din_p = prepared["Hp"], prepared["din_p"]
    Bp = _round_up(B, 8)
    t_chunk = _pick_time_chunk(S)

    # time-major, batch padded to sublanes, feature dim padded to lanes
    x_tm = jnp.transpose(x, (1, 0, 2))                              # (S, B, Din)
    cur = jnp.zeros((S, Bp, Din_p), jnp.float32).at[:, :B, :Din].set(x_tm)

    h_list, c_list = [], []
    for layer in prepared["lstm"]:
        gx = input_projection(cur, layer["wih_t"], layer["b"], t_chunk)   # (S, Bp, 4Hp)
        cur, h_n, c_n = lstm_recurrence(gx, layer["whh_t"], t_chunk)      # (S, Bp, Hp)
        h_list.append(h_n[:B, :H])
        c_list.append(c_n[:B, :H])

    probas_pad = linear_sigmoid(cur, prepared["linear"]["w"],
                                prepared["linear"]["b"], t_chunk)         # (S, Bp, Op)
    probas = jnp.transpose(probas_pad[:, :B, :O], (1, 0, 2))              # (B, S, O)

    h_n = jnp.stack(h_list, axis=0)                                       # (L, B, H)
    c_n = jnp.stack(c_list, axis=0)
    return probas, (h_n, c_n)


# ----------------------------------------------------------------------------
# Deterministic parameter init (PyTorch-style U(-1/sqrt(H), 1/sqrt(H))).
# ----------------------------------------------------------------------------
def init_params(key, input_size, output_size, hidden_size, num_layers):
    k = 1.0 / jnp.sqrt(jnp.float32(hidden_size))
    params = {"lstm": [], "linear": {}}
    for layer in range(num_layers):
        d_in = input_size if layer == 0 else hidden_size
        key, k1, k2, k3, k4 = jax.random.split(key, 5)
        params["lstm"].append({
            "w_ih": jax.random.uniform(k1, (4 * hidden_size, d_in), jnp.float32, -k, k),
            "w_hh": jax.random.uniform(k2, (4 * hidden_size, hidden_size),
                                       jnp.float32, -k, k),
            "b_ih": jax.random.uniform(k3, (4 * hidden_size,), jnp.float32, -k, k),
            "b_hh": jax.random.uniform(k4, (4 * hidden_size,), jnp.float32, -k, k),
        })
    key, k5, k6 = jax.random.split(key, 3)
    params["linear"]["w"] = jax.random.uniform(k5, (output_size, hidden_size),
                                               jnp.float32, -k, k)
    params["linear"]["b"] = jax.random.uniform(k6, (output_size,), jnp.float32, -k, k)
    return params


# ----------------------------------------------------------------------------
# Pure-JAX f32 reference for validation (PyTorch gate order i,f,g,o).
# ----------------------------------------------------------------------------
def reference_forward(x, params):
    B, S, _ = x.shape
    cur = x
    hs, cs = [], []
    for layer in params["lstm"]:
        w_ih, w_hh = layer["w_ih"], layer["w_hh"]
        b = layer["b_ih"] + layer["b_hh"]
        H = w_hh.shape[1]
        h = jnp.zeros((B, H), jnp.float32)
        c = jnp.zeros((B, H), jnp.float32)
        outs = []
        for t in range(S):
            gates = cur[:, t, :] @ w_ih.T + h @ w_hh.T + b
            i, f, g, o = jnp.split(gates, 4, axis=-1)
            i, f, o = jax.nn.sigmoid(i), jax.nn.sigmoid(f), jax.nn.sigmoid(o)
            g = jnp.tanh(g)
            c = f * c + i * g
            h = o * jnp.tanh(c)
            outs.append(h)
        cur = jnp.stack(outs, axis=1)
        hs.append(h)
        cs.append(c)
    logits = cur @ params["linear"]["w"].T + params["linear"]["b"]
    return jax.nn.sigmoid(logits), (jnp.stack(hs), jnp.stack(cs))


if __name__ == "__main__":
    # Small shapes consistent with the module's forward: x = (batch, seq, input_size).
    batch, seq, input_size = 2, 8, 4
    hidden_size, num_layers, output_size = 32, 2, 3

    key = jax.random.PRNGKey(0)
    key, xk = jax.random.split(key)
    x = jax.random.normal(xk, (batch, seq, input_size), jnp.float32)
    params = init_params(key, input_size, output_size, hidden_size, num_layers)
    prepared = prepare_params(params, input_size, hidden_size, output_size)

    probas, (h_n, c_n) = time_series_classifier_rnn(x, prepared)
    jax.block_until_ready((probas, h_n, c_n))

    # sanity-check against pure-JAX reference (kernel path uses bf16 matmuls)
    ref_probas, (ref_h, ref_c) = reference_forward(x, params)
    assert probas.shape == (batch, seq, output_size)
    assert h_n.shape == (num_layers, batch, hidden_size)
    assert c_n.shape == (num_layers, batch, hidden_size)
    assert jnp.allclose(probas, ref_probas, atol=2e-2, rtol=2e-2)
    assert jnp.allclose(h_n, ref_h, atol=2e-2, rtol=2e-2)
    assert jnp.allclose(c_n, ref_c, atol=2e-2, rtol=2e-2)

    print("KERNEL_OK")
</pallas_src>

<mosaic_0001>
module attributes {stable_mosaic.version = 11 : i64} {
  func.func @_input_proj_kernel(%arg0: i32, %arg1: memref<8x8x128xf32, #tpu.memory_space<vmem>>, %arg2: memref<128x512xbf16, #tpu.memory_space<vmem>>, %arg3: memref<1x512xf32, #tpu.memory_space<vmem>>, %arg4: memref<8x8x512xf32, #tpu.memory_space<vmem>>) attributes {dimension_semantics = [#tpu.dimension_semantics<parallel>], iteration_bounds = array<i64: 1>, scalar_prefetch = 0 : i64, scratch_operands = 0 : i64, tpu.core_type = #tpu.core_type<tc>, window_params = [{transform_indices = @transform_0, window_bounds = array<i64: 8, 8, 128>}, {pipeline_mode = #tpu.pipeline_mode<synchronous>, transform_indices = @transform_1, window_bounds = array<i64: 128, 512>}, {pipeline_mode = #tpu.pipeline_mode<synchronous>, transform_indices = @transform_2, window_bounds = array<i64: 1, 512>}, {transform_indices = @transform_3, window_bounds = array<i64: 8, 8, 512>}]} {
    %c0 = arith.constant 0 : index
    %c0_0 = arith.constant 0 : index
    %c0_1 = arith.constant 0 : index
    %0 = vector.load %arg1[%c0, %c0_0, %c0_1] : memref<8x8x128xf32, #tpu.memory_space<vmem>>, vector<8x8x128xf32>
    %1 = vector.shape_cast %0 : vector<8x8x128xf32> to vector<64x128xf32>
    %2 = arith.truncf %1 : vector<64x128xf32> to vector<64x128xbf16>
    %c0_2 = arith.constant 0 : index
    %c0_3 = arith.constant 0 : index
    %3 = vector.load %arg2[%c0_2, %c0_3] : memref<128x512xbf16, #tpu.memory_space<vmem>>, vector<128x512xbf16>
    %cst = arith.constant dense<0.000000e+00> : vector<64x512xf32>
    %4 = tpu.matmul %2, %3, %cst {dimension_numbers = #tpu.dot_dimension_numbers<[1], [0], [0], [1], [0, 0, 1, 1], [], []>} : vector<64x128xbf16>, vector<128x512xbf16>, vector<64x512xf32> -> vector<64x512xf32>
    %c0_4 = arith.constant 0 : index
    %c0_5 = arith.constant 0 : index
    %5 = vector.load %arg3[%c0_4, %c0_5] : memref<1x512xf32, #tpu.memory_space<vmem>>, vector<1x512xf32>
    %6 = vector.broadcast %5 : vector<1x512xf32> to vector<64x512xf32>
    %7 = arith.addf %4, %6 : vector<64x512xf32>
    %8 = vector.shape_cast %7 : vector<64x512xf32> to vector<8x8x512xf32>
    %c0_6 = arith.constant 0 : index
    %c0_7 = arith.constant 0 : index
    %c0_8 = arith.constant 0 : index
    %9 = vector.load %arg4[%c0_6, %c0_7, %c0_8] : memref<8x8x512xf32, #tpu.memory_space<vmem>>, vector<8x8x512xf32>
    tpu.vector_store %arg4[%c0_6, %c0_7, %c0_8], %8 {strides = array<i32>} : memref<8x8x512xf32, #tpu.memory_space<vmem>>, vector<8x8x512xf32>,
    return
  }
  func.func @transform_0(%arg0: i32) -> (i32, i32, i32) {
    %c0_i32 = arith.constant 0 : i32
    %c0_i32_0 = arith.constant 0 : i32
    %c0_i32_1 = arith.constant 0 : i32
    return %arg0, %c0_i32, %c0_i32_0 : i32, i32, i32
  }
  func.func @transform_1(%arg0: i32) -> (i32, i32) {
    %c0_i32 = arith.constant 0 : i32
    %c0_i32_0 = arith.constant 0 : i32
    %c0_i32_1 = arith.constant 0 : i32
    return %c0_i32, %c0_i32_0 : i32, i32
  }
  func.func @transform_2(%arg0: i32) -> (i32, i32) {
    %c0_i32 = arith.constant 0 : i32
    %c0_i32_0 = arith.constant 0 : i32
    %c0_i32_1 = arith.constant 0 : i32
    return %c0_i32, %c0_i32_0 : i32, i32
  }
  func.func @transform_3(%arg0: i32) -> (i32, i32, i32) {
    %c0_i32 = arith.constant 0 : i32
    %c0_i32_0 = arith.constant 0 : i32
    %c0_i32_1 = arith.constant 0 : i32
    return %arg0, %c0_i32, %c0_i32_0 : i32, i32, i32
  }
}

</mosaic_0001>

<bundles_post_ra>
// kernel: tpu_custom_call.1
= control target key start
LH: loop header
LB: loop body
LE: loop exit
PB: predicated region body
PF: predicated region fallthrough
CT: control target
= control target key end

     0   :  { %8 = vsyncpa [#allocation3], 0  ;;  %s745_s0 = inlined_call_operand.hbm [shape: f32[8,8,128], index: 0, kind: input, shape index: {}]   ;;  %s746_s1 = inlined_call_operand.hbm [shape: bf16[128,512], index: 1, kind: input, shape index: {}]   ;;  %s747_s2 = inlined_call_operand.vmem [shape: f32[1,512], index: 2, kind: input, shape index: {}]   ;;  %s748_s3 = inlined_call_operand.hbm [shape: f32[8,8,512], index: 3, kind: output, shape index: {}]  }
   0x1   :  { %9 = vsyncpa [#allocation6], 0 }
   0x2   :  { %10 = vsyncpa [#allocation4], 0  ;;  %s628_s12 = smov [#allocation2]   ;;  %s556_s16 = scalar_lea.hbm %s745_s0, 1024 }
   0x3   :  { %s16_s13 = sshll.u32 %s628_s12, 4  ;;  %p557_p0 = scmp.ne.s32.totalorder %s745_s0, %s556_s16  ;;  %s17_s13 = int_to_ptr.vmem [resolvable:$true] %s16_s13 }
   0x4   :  { %p560_p1 = scmp.lt.u32.totalorder %s556_s16, %s745_s0 }
   0x6   :  { %p562_p2 = pnand %p560_p1, %p557_p0 }
   0x8   :  { %565 = shalt.err (!%p562_p2)
}
   0x9   :  { %s566_s21 = scalar_lea.vmem %s17_s13, 1024  ;;  %p571_p4 = scmp.lt.s32.totalorder %s17_s13, %s17_s13 }
   0xa   :  { %p567_p3 = scmp.ne.s32.totalorder %s17_s13, %s566_s21  ;;  %p572_p5 = scmp.lt.s32.totalorder %s566_s21, %s566_s21 }
   0xc   :  { %p573_p6 = por %p572_p5, %p571_p4 }
   0xe   :  { %p574_p7 = pnand %p573_p6, %p567_p3 }
  0x10   :  { %577 = shalt.err (!%p574_p7)
}
  0x11   :  { %s629_s22 = smov 128   ;;  %s630_s23 = smov 8  }
  0x12   :  { %22 = dma.hbm_to_vmem [thread:$0]  %s745_s0, 1024, %s17_s13, [#allocation3], %s629_s22, %s629_s22, %s630_s23  }
  0x13   :  { %s631_s26 = smov [#allocation5]   ;;  %s578_s30 = scalar_lea.hbm %s746_s1, 4096 }
  0x14   :  { %s28_s27 = sshll.u32 %s631_s26, 4  ;;  %p579_p8 = scmp.ne.s32.totalorder %s746_s1, %s578_s30  ;;  %s29_s27 = int_to_ptr.vmem [resolvable:$true] %s28_s27 }
  0x15   :  { %p582_p9 = scmp.lt.u32.totalorder %s578_s30, %s746_s1 }
  0x17   :  { %p584_p10 = pnand %p582_p9, %p579_p8 }
  0x19   :  { %587 = shalt.err (!%p584_p10)
}
  0x1a   :  { %s588_s8 = scalar_lea.vmem %s29_s27, 4096  ;;  %p593_p12 = scmp.lt.s32.totalorder %s29_s27, %s29_s27 }
  0x1b   :  { %p589_p11 = scmp.ne.s32.totalorder %s29_s27, %s588_s8  ;;  %p594_p13 = scmp.lt.s32.totalorder %s588_s8, %s588_s8 }
  0x1d   :  { %p595_p0 = por %p594_p13, %p593_p12 }
  0x1f   :  { %p596_p1 = pnand %p595_p0, %p589_p11 }
  0x21   :  { %599 = shalt.err (!%p596_p1)
}
  0x22   :  { %s632_s0 = smov 256   ;;  %s633_s9 = smov 16  }
  0x23   :  { %34 = dma.hbm_to_vmem [thread:$0]  %s746_s1, 4096, %s29_s27, [#allocation6], %s632_s0, %s632_s0, %s633_s9  }
  0x24   :  { %622 = dma.done.wait [#allocation3], 1024  }
  0x25   :  { %623 = vsyncadd [#allocation3], 4294966272 }
  0x26   :  { %624 = dma.done.wait [#allocation6], 4096  }
  0x27   :  { %625 = vsyncadd [#allocation6], 4294963200  ;;  %v634_v0 = vmov 0   ;;  %v508_v1 = vld [vmem:[#allocation5 + $0x4] ss:$16 sps:$4 sm:$0xff]   ;;  %v45_v34 = vld [vmem:[#allocation2 + $0x8] sm:$0xff]  ;;  %v90_v45 = vlaneseq }
  0x28   :  { %302 = vmatprep.mubr.bf16.mxu0 %v634_v0  ;;  %375 = vmatprep.mubr.bf16.mxu1 %v634_v0  ;;  %v510_v2 = vld [vmem:[#allocation5 + $0xc] ss:$16 sps:$4 sm:$0xff]   ;;  %v512_v3 = vld [vmem:[#allocation5] ss:$16 sps:$4 sm:$0xff]   ;;  %v513_v4 = vld [vmem:[#allocation5 + $0x8] ss:$16 sps:$4 sm:$0xff]  }
  0x29   :  { %270 = vmatprep.subr.bf16.mxu0 %v508_v1  ;;  %343 = vmatprep.subr.bf16.mxu1 %v510_v2  ;;  %v514_v5 = vld [vmem:[#allocation5 + $0x24] ss:$16 sps:$4 sm:$0xff]   ;;  %v516_v6 = vld [vmem:[#allocation5 + $0x2c] ss:$16 sps:$4 sm:$0xff]   ;;  %v518_v7 = vld [vmem:[#allocation5 + $0x20] ss:$16 sps:$4 sm:$0xff]  }
  0x2a   :  { %271 = vmatpush1.bf16.msra.mxu0 %v512_v3  ;;  %344 = vmatpush1.bf16.msra.mxu1 %v513_v4  ;;  %v519_v8 = vld [vmem:[#allocation5 + $0x28] ss:$16 sps:$4 sm:$0xff]   ;;  %v520_v9 = vld [vmem:[#allocation5 + $0x44] ss:$16 sps:$4 sm:$0xff]   ;;  %v522_v10 = vld [vmem:[#allocation5 + $0x4c] ss:$16 sps:$4 sm:$0xff]  }
  0x2b   :  { %272 = vmatprep.subr.bf16.mxu0 %v514_v5  ;;  %345 = vmatprep.subr.bf16.mxu1 %v516_v6  ;;  %v524_v11 = vld [vmem:[#allocation5 + $0x40] ss:$16 sps:$4 sm:$0xff]   ;;  %v525_v12 = vld [vmem:[#allocation5 + $0x48] ss:$16 sps:$4 sm:$0xff]   ;;  %v526_v13 = vld [vmem:[#allocation5 + $0x64] ss:$16 sps:$4 sm:$0xff]  }
  0x2c   :  { %v528_v14 = vld [vmem:[#allocation5 + $0x6c] ss:$16 sps:$4 sm:$0xff]   ;;  %v530_v15 = vld [vmem:[#allocation5 + $0x60] ss:$16 sps:$4 sm:$0xff]   ;;  %v531_v16 = vld [vmem:[#allocation5 + $0x68] ss:$16 sps:$4 sm:$0xff]  }
  0x2d   :  { %v532_v17 = vld [vmem:[#allocation5 + $0x84] ss:$16 sps:$4 sm:$0xff]   ;;  %v534_v18 = vld [vmem:[#allocation5 + $0x8c] ss:$16 sps:$4 sm:$0xff]   ;;  %v536_v19 = vld [vmem:[#allocation5 + $0x80] ss:$16 sps:$4 sm:$0xff]  }
  0x2e   :  { %273 = vmatpush1.bf16.msra.mxu0 %v518_v7  ;;  %346 = vmatpush1.bf16.msra.mxu1 %v519_v8  ;;  %v537_v20 = vld [vmem:[#allocation5 + $0x88] ss:$16 sps:$4 sm:$0xff]   ;;  %v538_v21 = vld [vmem:[#allocation5 + $0xa4] ss:$16 sps:$4 sm:$0xff]   ;;  %v540_v22 = vld [vmem:[#allocation5 + $0xac] ss:$16 sps:$4 sm:$0xff]  }
  0x2f   :  { %274 = vmatprep.subr.bf16.mxu0 %v520_v9  ;;  %347 = vmatprep.subr.bf16.mxu1 %v522_v10  ;;  %v542_v23 = vld [vmem:[#allocation5 + $0xa0] ss:$16 sps:$4 sm:$0xff]   ;;  %v543_v24 = vld [vmem:[#allocation5 + $0xa8] ss:$16 sps:$4 sm:$0xff]   ;;  %v544_v25 = vld [vmem:[#allocation5 + $0xc4] ss:$16 sps:$4 sm:$0xff]  }
  0x30   :  { %v546_v26 = vld [vmem:[#allocation5 + $0xcc] ss:$16 sps:$4 sm:$0xff]   ;;  %v548_v27 = vld [vmem:[#allocation5 + $0xc0] ss:$16 sps:$4 sm:$0xff]   ;;  %v549_v28 = vld [vmem:[#allocation5 + $0xc8] ss:$16 sps:$4 sm:$0xff]  }
  0x31   :  { %v550_v29 = vld [vmem:[#allocation5 + $0xe4] ss:$16 sps:$4 sm:$0xff]   ;;  %v552_v30 = vld [vmem:[#allocation5 + $0xec] ss:$16 sps:$4 sm:$0xff]   ;;  %v554_v31 = vld [vmem:[#allocation5 + $0xe0] ss:$16 sps:$4 sm:$0xff]  }
  0x32   :  { %275 = vmatpush1.bf16.msra.mxu0 %v524_v11  ;;  %348 = vmatpush1.bf16.msra.mxu1 %v525_v12  ;;  %v555_v32 = vld [vmem:[#allocation5 + $0xe8] ss:$16 sps:$4 sm:$0xff]   ;;  %v44_v33 = vld [vmem:[#allocation2] sm:$0xff]  ;;  %v46_v36 = vld [vmem:[#allocation2 + $0x10] sm:$0xff]  ;;  %v91_v46 = vshrl.u32 %v90_v45, 7 }
  0x33   :  { %276 = vmatprep.subr.bf16.mxu0 %v526_v13  ;;  %349 = vmatprep.subr.bf16.mxu1 %v528_v14  ;;  %v52_v35 = vpack.c.bf16 %v45_v34, %v44_v33  ;;  %v47_v37 = vld [vmem:[#allocation2 + $0x18] sm:$0xff]  ;;  %v48_v39 = vld [vmem:[#allocation2 + $0x20] sm:$0xff]  ;;  %v49_v40 = vld [vmem:[#allocation2 + $0x28] sm:$0xff] }
  0x34   :  { %v53_v38 = vpack.c.bf16 %v47_v37, %v46_v36  ;;  %v54_v41 = vpack.c.bf16 %v49_v40, %v48_v39  ;;  %v50_v42 = vld [vmem:[#allocation2 + $0x30] sm:$0xff]  ;;  %v51_v43 = vld [vmem:[#allocation2 + $0x38] sm:$0xff]  ;;  %v92_v47 = vsub.s32 0, %v91_v46  ;;  %v100_v48 = vsub.s32 2, %v91_v46  ;;  %v88_v49 = vld [vmem:[%s747_s2] sm:$0xf] }
  0x35   :  { %v55_v44 = vpack.c.bf16 %v51_v43, %v50_v42  ;;  %v96_v50 = vsub.s32 1, %v91_v46  ;;  %v104_v51 = vsub.s32 3, %v91_v46  ;;  %s635_s2 = smov [#allocation7]  }
  0x36   :  { %277 = vmatpush1.bf16.msra.mxu0 %v530_v15  ;;  %350 = vmatpush1.bf16.msra.mxu1 %v531_v16  ;;  %v693_v52 = vrot.slane %v88_v49, %v92_v47  ;;  %v695_v53 = vrot.slane %v88_v49, %v100_v48  ;;  %s453_s13 = sshll.u32 %s635_s2, 4  ;;  %s454_s13 = int_to_ptr.vmem [resolvable:$true] %s453_s13 }
  0x37   :  { %278 = vmatprep.subr.bf16.mxu0 %v532_v17  ;;  %351 = vmatprep.subr.bf16.mxu1 %v534_v18  ;;  %v697_v54 = vrot.slane %v88_v49, %v96_v50  ;;  %v699_v55 = vrot.slane %v88_v49, %v104_v51  ;;  %s600_s14 = scalar_lea.vmem %s454_s13, 4096  ;;  %p605_p3 = scmp.lt.s32.totalorder %s454_s13, %s454_s13 }
  0x38   :  { %p601_p2 = scmp.ne.s32.totalorder %s454_s13, %s600_s14  ;;  %p606_p4 = scmp.lt.s32.totalorder %s600_s14, %s600_s14 }
  0x3a   :  { %279 = vmatpush1.bf16.msra.mxu0 %v536_v19  ;;  %352 = vmatpush1.bf16.msra.mxu1 %v537_v20  ;;  %p607_p5 = por %p606_p4, %p605_p3 }
  0x3b   :  { %280 = vmatprep.subr.bf16.mxu0 %v538_v21  ;;  %353 = vmatprep.subr.bf16.mxu1 %v540_v22 }
  0x3c   :  { %p608_p6 = pnand %p607_p5, %p601_p2 }
  0x3e   :  { %281 = vmatpush1.bf16.msra.mxu0 %v542_v23  ;;  %354 = vmatpush1.bf16.msra.mxu1 %v543_v24 }
  0x3f   :  { %282 = vmatprep.subr.bf16.mxu0 %v544_v25  ;;  %355 = vmatprep.subr.bf16.mxu1 %v546_v26 }
  0x42   :  { %283 = vmatpush1.bf16.msra.mxu0 %v548_v27  ;;  %356 = vmatpush1.bf16.msra.mxu1 %v549_v28 }
  0x43   :  { %284 = vmatprep.subr.bf16.mxu0 %v550_v29  ;;  %357 = vmatprep.subr.bf16.mxu1 %v552_v30 }
  0x46   :  { %285 = vmatpush1.bf16.msra.mxu0 %v554_v31  ;;  %358 = vmatpush1.bf16.msra.mxu1 %v555_v32 }
  0x49   :  { %303 = vmatmul.mubr.bf16.vlgmr.msra.gmra.mrb[0].mxu0 %v52_v35  ;;  %376 = vmatmul.mubr.bf16.vlgmr.msra.gmra.mrb[0].mxu1 %v52_v35 }
  0x4a   :  { %312 = vmatprep.mubr.bf16.mxu0 %v634_v0  ;;  %385 = vmatprep.mubr.bf16.mxu1 %v634_v0 }
  0x51   :  { %313 = vmatmul.mubr.bf16.gmra.mrb[4].mxu0 %v53_v38  ;;  %386 = vmatmul.mubr.bf16.gmra.mrb[4].mxu1 %v53_v38 }
  0x52   :  { %322 = vmatprep.mubr.bf16.mxu0 %v634_v0  ;;  %395 = vmatprep.mubr.bf16.mxu1 %v634_v0 }
  0x59   :  { %323 = vmatmul.mubr.bf16.gmra.mrb[8].mxu0 %v54_v41  ;;  %396 = vmatmul.mubr.bf16.gmra.mrb[8].mxu1 %v54_v41 }
  0x5a   :  { %332 = vmatprep.mubr.bf16.mxu0 %v634_v0  ;;  %405 = vmatprep.mubr.bf16.mxu1 %v634_v0 }
  0x61   :  { %333 = vmatmul.mubr.bf16.gmra.mrb[12].mxu0 %v55_v44  ;;  %406 = vmatmul.mubr.bf16.gmra.mrb[12].mxu1 %v55_v44 }
 0x11c   :  { %v304_v56 = vpop.f32.mrb[0].mxu0  ;;  %v377_v57 = vpop.f32.mrb[0].mxu1 }
 0x11d   :  { %v305_v58 = vadd.f32 %v304_v56, %v693_v52  ;;  %v378_v59 = vadd.f32 %v377_v57, %v695_v53  ;;  %v306_v60 = vpop.f32.mrb[1].mxu0  ;;  %v379_v61 = vpop.f32.mrb[1].mxu1 }
 0x11e   :  { %v307_v62 = vadd.f32 %v306_v60, %v697_v54  ;;  %v380_v63 = vadd.f32 %v379_v61, %v699_v55  ;;  %v308_v0 = vpop.f32.mrb[2].mxu0  ;;  %v381_v1 = vpop.f32.mrb[2].mxu1 }
 0x11f   :  { %416 = vst [vmem:[#allocation7] sm:$0xff] %v305_v58  ;;  %418 = vst [vmem:[#allocation7 + $0x10] sm:$0xff] %v378_v59  ;;  %v309_v2 = vadd.f32 %v308_v0, %v693_v52  ;;  %v382_v3 = vadd.f32 %v381_v1, %v695_v53  ;;  %v310_v4 = vpop.f32.mrb[3].mxu0  ;;  %v383_v5 = vpop.f32.mrb[3].mxu1 }
 0x120   :  { %417 = vst [vmem:[#allocation7 + $0x8] sm:$0xff] %v307_v62  ;;  %419 = vst [vmem:[#allocation7 + $0x18] sm:$0xff] %v380_v63  ;;  %v311_v6 = vadd.f32 %v310_v4, %v697_v54  ;;  %v384_v7 = vadd.f32 %v383_v5, %v699_v55 }
 0x121   :  { %420 = vst [vmem:[#allocation7 + $0x20] sm:$0xff] %v309_v2  ;;  %422 = vst [vmem:[#allocation7 + $0x30] sm:$0xff] %v382_v3 }
 0x122   :  { %421 = vst [vmem:[#allocation7 + $0x28] sm:$0xff] %v311_v6  ;;  %423 = vst [vmem:[#allocation7 + $0x38] sm:$0xff] %v384_v7 }
 0x124   :  { %v314_v8 = vpop.f32.mrb[4].mxu0  ;;  %v387_v9 = vpop.f32.mrb[4].mxu1 }
 0x125   :  { %v315_v10 = vadd.f32 %v314_v8, %v693_v52  ;;  %v388_v11 = vadd.f32 %v387_v9, %v695_v53  ;;  %v316_v12 = vpop.f32.mrb[5].mxu0  ;;  %v389_v13 = vpop.f32.mrb[5].mxu1 }
 0x126   :  { %v317_v14 = vadd.f32 %v316_v12, %v697_v54  ;;  %v390_v15 = vadd.f32 %v389_v13, %v699_v55  ;;  %v318_v16 = vpop.f32.mrb[6].mxu0  ;;  %v391_v17 = vpop.f32.mrb[6].mxu1 }
 0x127   :  { %424 = vst [vmem:[#allocation7 + $0x40] sm:$0xff] %v315_v10  ;;  %426 = vst [vmem:[#allocation7 + $0x50] sm:$0xff] %v388_v11  ;;  %v319_v18 = vadd.f32 %v318_v16, %v693_v52  ;;  %v392_v19 = vadd.f32 %v391_v17, %v695_v53  ;;  %v320_v20 = vpop.f32.mrb[7].mxu0  ;;  %v393_v21 = vpop.f32.mrb[7].mxu1 }
 0x128   :  { %425 = vst [vmem:[#allocation7 + $0x48] sm:$0xff] %v317_v14  ;;  %427 = vst [vmem:[#allocation7 + $0x58] sm:$0xff] %v390_v15  ;;  %v321_v22 = vadd.f32 %v320_v20, %v697_v54  ;;  %v394_v23 = vadd.f32 %v393_v21, %v699_v55 }
 0x129   :  { %428 = vst [vmem:[#allocation7 + $0x60] sm:$0xff] %v319_v18  ;;  %430 = vst [vmem:[#allocation7 + $0x70] sm:$0xff] %v392_v19 }
 0x12a   :  { %429 = vst [vmem:[#allocation7 + $0x68] sm:$0xff] %v321_v22  ;;  %431 = vst [vmem:[#allocation7 + $0x78] sm:$0xff] %v394_v23 }
 0x12c   :  { %v324_v24 = vpop.f32.mrb[8].mxu0  ;;  %v397_v25 = vpop.f32.mrb[8].mxu1 }
 0x12d   :  { %v325_v26 = vadd.f32 %v324_v24, %v693_v52  ;;  %v398_v27 = vadd.f32 %v397_v25, %v695_v53  ;;  %v326_v28 = vpop.f32.mrb[9].mxu0  ;;  %v399_v29 = vpop.f32.mrb[9].mxu1 }
 0x12e   :  { %v327_v30 = vadd.f32 %v326_v28, %v697_v54  ;;  %v400_v31 = vadd.f32 %v399_v29, %v699_v55  ;;  %v328_v32 = vpop.f32.mrb[10].mxu0  ;;  %v401_v33 = vpop.f32.mrb[10].mxu1 }
 0x12f   :  { %432 = vst [vmem:[#allocation7 + $0x80] sm:$0xff] %v325_v26  ;;  %434 = vst [vmem:[#allocation7 + $0x90] sm:$0xff] %v398_v27  ;;  %v329_v34 = vadd.f32 %v328_v32, %v693_v52  ;;  %v402_v35 = vadd.f32 %v401_v33, %v695_v53  ;;  %v330_v36 = vpop.f32.mrb[11].mxu0  ;;  %v403_v37 = vpop.f32.mrb[11].mxu1 }
 0x130   :  { %433 = vst [vmem:[#allocation7 + $0x88] sm:$0xff] %v327_v30  ;;  %435 = vst [vmem:[#allocation7 + $0x98] sm:$0xff] %v400_v31  ;;  %v331_v38 = vadd.f32 %v330_v36, %v697_v54  ;;  %v404_v39 = vadd.f32 %v403_v37, %v699_v55 }
 0x131   :  { %436 = vst [vmem:[#allocation7 + $0xa0] sm:$0xff] %v329_v34  ;;  %438 = vst [vmem:[#allocation7 + $0xb0] sm:$0xff] %v402_v35 }
 0x132   :  { %437 = vst [vmem:[#allocation7 + $0xa8] sm:$0xff] %v331_v38  ;;  %439 = vst [vmem:[#allocation7 + $0xb8] sm:$0xff] %v404_v39 }
 0x134   :  { %v334_v40 = vpop.f32.mrb[12].mxu0  ;;  %v407_v41 = vpop.f32.mrb[12].mxu1 }
 0x135   :  { %v335_v42 = vadd.f32 %v334_v40, %v693_v52  ;;  %v408_v43 = vadd.f32 %v407_v41, %v695_v53  ;;  %v336_v44 = vpop.f32.mrb[13].mxu0  ;;  %v409_v45 = vpop.f32.mrb[13].mxu1 }
 0x136   :  { %v337_v46 = vadd.f32 %v336_v44, %v697_v54  ;;  %v410_v47 = vadd.f32 %v409_v45, %v699_v55  ;;  %v338_v48 = vpop.f32.mrb[14].mxu0  ;;  %v411_v49 = vpop.f32.mrb[14].mxu1 }
 0x137   :  { %440 = vst [vmem:[#allocation7 + $0xc0] sm:$0xff] %v335_v42  ;;  %442 = vst [vmem:[#allocation7 + $0xd0] sm:$0xff] %v408_v43  ;;  %v339_v50 = vadd.f32 %v338_v48, %v693_v52  ;;  %v412_v51 = vadd.f32 %v411_v49, %v695_v53  ;;  %v340_v56 = vpop.f32.mrb[15].mxu0  ;;  %v413_v57 = vpop.f32.mrb[15].mxu1 }
 0x138   :  { %441 = vst [vmem:[#allocation7 + $0xc8] sm:$0xff] %v337_v46  ;;  %443 = vst [vmem:[#allocation7 + $0xd8] sm:$0xff] %v410_v47  ;;  %v341_v58 = vadd.f32 %v340_v56, %v697_v54  ;;  %v414_v59 = vadd.f32 %v413_v57, %v699_v55 }
 0x139   :  { %444 = vst [vmem:[#allocation7 + $0xe0] sm:$0xff] %v339_v50  ;;  %446 = vst [vmem:[#allocation7 + $0xf0] sm:$0xff] %v412_v51 }
 0x13a   :  { %445 = vst [vmem:[#allocation7 + $0xe8] sm:$0xff] %v341_v58  ;;  %447 = vst [vmem:[#allocation7 + $0xf8] sm:$0xff] %v414_v59 }
 0x13b   :  { %611 = shalt.err (!%p608_p6)
}
 0x13c   :  { %s612_s17 = scalar_lea.hbm %s748_s3, 4096 }
 0x13d   :  { %p613_p7 = scmp.ne.s32.totalorder %s748_s3, %s612_s17  ;;  %p616_p8 = scmp.lt.u32.totalorder %s612_s17, %s748_s3 }
 0x13f   :  { %p618_p9 = pnand %p616_p8, %p613_p7 }
 0x141   :  { %621 = shalt.err (!%p618_p9)
}
 0x142   :  { %s636_s22 = smov 512   ;;  %s637_s23 = smov 32  }
 0x143   :  { %459 = dma.vmem_to_hbm [thread:$0]  %s454_s13, 4096, %s748_s3, [#allocation4], %s636_s22, %s636_s22, %s637_s23  }
 0x144   :  { %626 = dma.done.wait [#allocation4], 4096  }
 0x145   :  { %627 = vsyncadd [#allocation4], 4294963200 }
 0x146   :  { %463 = vsyncpa [#allocation3], 1 }
 0x147   :  { %464 = vsyncpa [#allocation6], 1 }
 0x148   :  { %465 = vsyncpa [#allocation4], 1 }

</bundles_post_ra>
